<compile_context>
chip_gen: v5e
topology: v5e:2x2
jax: 0.10.0
libtpu: 0.0.40
codegen_flags: <defaults>
</compile_context>

<pallas_src>
import math

import jax
import jax.numpy as jnp
from jax.experimental import pallas as pl
from jax.experimental.pallas import tpu as pltpu


def _stan_kernel(beta_ref, x_ref, o_ref):
    # Upcast to f32 in-register; free for a memory-bound kernel and required
    # for accuracy (and for v5e, whose VPU/EUP lack bf16).
    x = x_ref[...].astype(jnp.float32)
    b = beta_ref[...]                       # (1, lanes) f32, sublane-broadcast
    # tanh -> EUP slot, mul/add -> VPU; well under the HBM roofline on v5e/v6e.
    o_ref[...] = (jnp.tanh(x) * (1.0 + b * x)).astype(o_ref.dtype)


def stan(x, beta, *, row_tile=None):
    """Self-scalable Tanh: tanh(x) * (1 + beta * x), beta over the last dim."""
    if x.shape[-1] != beta.shape[-1]:
        raise ValueError(
            "The last dimension of the input must be equal to the dimension of "
            f"Stan parameters. Got inputs: {x.shape}, params: {beta.shape}")

    orig_shape = x.shape
    feat = x.shape[-1]
    rows = x.size // feat

    x2d = x.reshape(rows, feat)
    beta_row = beta.reshape(1, feat).astype(jnp.float32)
    lanes = feat

    # Lane-density: fold groups of rows into the lane axis so the output lane
    # width is a multiple of 128 (unmasked `vst` instead of masked partial
    # stores).  Generalized lcm-based fold handles awkward widths (48, 96,
    # 33, 160, ...), bounded at group <= 128.
    if feat % 128 != 0:
        group = math.lcm(feat, 128) // feat
        if 1 < group <= 128 and rows % group == 0 and rows >= group:
            rows //= group
            lanes = group * feat
            x2d = x2d.reshape(rows, lanes)
            beta_row = jnp.tile(beta_row, (1, group))

    itemsize = jnp.dtype(x.dtype).itemsize
    sublane = {4: 8, 2: 16, 1: 32}.get(itemsize, 8)

    if row_tile is None:
        target_tile_bytes = 2 << 20                     # ~2 MiB input tile
        row_tile = min(max(target_tile_bytes // (lanes * itemsize), sublane),
                       32768)
    row_tile = max(sublane, (row_tile // sublane) * sublane)

    if row_tile >= rows:
        # Whole input fits one tile.  For sizeable inputs, keep >= 4 grid
        # steps so the pipeline double-buffers and the "parallel" axis has
        # work for both v7x TensorCores; tiny inputs get a single
        # full-extent block (per-step overhead would dominate otherwise).
        if rows * lanes * itemsize >= (512 << 10) and rows >= 4 * sublane:
            row_tile = max(sublane, (pl.cdiv(rows, 4) // sublane) * sublane)
        else:
            row_tile = rows

    grid = (pl.cdiv(rows, row_tile),)

    n_elem = rows * lanes
    cost = pl.CostEstimate(
        flops=3 * n_elem,
        transcendentals=n_elem,
        bytes_accessed=2 * n_elem * itemsize + lanes * 4,
    )

    out2d = pl.pallas_call(
        _stan_kernel,
        out_shape=jax.ShapeDtypeStruct((rows, lanes), x.dtype),
        grid_spec=pltpu.PrefetchScalarGridSpec(
            num_scalar_prefetch=0,
            grid=grid,
            in_specs=[
                pl.BlockSpec((1, lanes), lambda i: (0, 0)),          # beta
                pl.BlockSpec((row_tile, lanes), lambda i: (i, 0)),   # x tile
            ],
            out_specs=pl.BlockSpec((row_tile, lanes), lambda i: (i, 0)),
        ),
        compiler_params=pltpu.CompilerParams(
            dimension_semantics=("parallel",)),
        cost_estimate=cost,
    )(beta_row, x2d)

    return out2d.reshape(orig_shape)


def _stan_ref(x, beta):
    xf = x.astype(jnp.float32)
    bf = beta.astype(jnp.float32)
    return (jnp.tanh(xf) * (1.0 + bf * xf)).astype(x.dtype)


if __name__ == "__main__":
    key = jax.random.PRNGKey(0)

    # 1) Typical use: hidden features = 32, beta initialized to ones.
    feat = 32
    x = jax.random.normal(key, (2, 8, feat), dtype=jnp.float32)
    beta = jnp.ones((feat,), dtype=jnp.float32)
    out = jax.block_until_ready(stan(x, beta))
    assert out.shape == x.shape and out.dtype == x.dtype
    assert jnp.allclose(out, _stan_ref(x, beta), atol=1e-6, rtol=1e-5)

    # 2) Docstring example: out_features=1, input [[0],[1],[2]].
    ex = jnp.array([[0.0], [1.0], [2.0]], dtype=jnp.float32)
    beta1 = jnp.ones((1,), dtype=jnp.float32)
    ex_out = jax.block_until_ready(stan(ex, beta1))
    ex_ref = jnp.array([[0.0], [1.5232], [2.8921]], dtype=jnp.float32)
    assert jnp.allclose(ex_out, ex_ref, atol=1e-3)
    assert jnp.allclose(ex_out, _stan_ref(ex, beta1), atol=1e-6)

    # 3) Non-trivial beta + multi-block grid with a masked partial last block.
    k1, k2 = jax.random.split(key)
    x3 = jax.random.normal(k1, (100, feat), dtype=jnp.float32)
    beta3 = jax.random.normal(k2, (feat,), dtype=jnp.float32)
    out3 = jax.block_until_ready(stan(x3, beta3, row_tile=8))
    assert jnp.allclose(out3, _stan_ref(x3, beta3), atol=1e-6, rtol=1e-5)

    # 4) Awkward feature width (48) in bf16: exercises lcm lane-folding and
    #    the f32-in-register compute / bf16 I/O path.
    feat4 = 48
    x4 = jax.random.normal(k2, (16, feat4), dtype=jnp.bfloat16)
    beta4 = (1.0 + 0.1 * jax.random.normal(k1, (feat4,))).astype(jnp.bfloat16)
    out4 = jax.block_until_ready(stan(x4, beta4))
    assert out4.dtype == jnp.bfloat16 and out4.shape == x4.shape
    assert jnp.allclose(out4.astype(jnp.float32),
                        _stan_ref(x4, beta4).astype(jnp.float32),
                        atol=2e-2, rtol=2e-2)

    print("KERNEL_OK")
</pallas_src>

<mosaic_0001>
module attributes {stable_mosaic.version = 11 : i64} {
  func.func @_stan_kernel(%arg0: i32, %arg1: memref<1x128xf32, #tpu.memory_space<vmem>>, %arg2: memref<4x128xf32, #tpu.memory_space<vmem>>, %arg3: memref<4x128xf32, #tpu.memory_space<vmem>>) attributes {dimension_semantics = [#tpu.dimension_semantics<parallel>], iteration_bounds = array<i64: 1>, scalar_prefetch = 0 : i64, scratch_operands = 0 : i64, tpu.core_type = #tpu.core_type<tc>, window_params = [{pipeline_mode = #tpu.pipeline_mode<synchronous>, transform_indices = @transform_0, window_bounds = array<i64: 1, 128>}, {transform_indices = @transform_1, window_bounds = array<i64: 4, 128>}, {transform_indices = @transform_2, window_bounds = array<i64: 4, 128>}]} {
    %c0 = arith.constant 0 : index
    %c0_0 = arith.constant 0 : index
    %0 = vector.load %arg2[%c0, %c0_0] : memref<4x128xf32, #tpu.memory_space<vmem>>, vector<4x128xf32>
    %c0_1 = arith.constant 0 : index
    %c0_2 = arith.constant 0 : index
    %1 = vector.load %arg1[%c0_1, %c0_2] : memref<1x128xf32, #tpu.memory_space<vmem>>, vector<1x128xf32>
    %2 = math.tanh %0 : vector<4x128xf32>
    %3 = vector.broadcast %1 : vector<1x128xf32> to vector<4x128xf32>
    %4 = arith.mulf %3, %0 : vector<4x128xf32>
    %cst = arith.constant 1.000000e+00 : f32
    %5 = vector.broadcast %cst : f32 to vector<4x128xf32>
    %6 = arith.addf %5, %4 : vector<4x128xf32>
    %7 = arith.mulf %2, %6 : vector<4x128xf32>
    %c0_3 = arith.constant 0 : index
    %c0_4 = arith.constant 0 : index
    %8 = vector.load %arg3[%c0_3, %c0_4] : memref<4x128xf32, #tpu.memory_space<vmem>>, vector<4x128xf32>
    tpu.vector_store %arg3[%c0_3, %c0_4], %7 {strides = array<i32>} : memref<4x128xf32, #tpu.memory_space<vmem>>, vector<4x128xf32>,
    return
  }
  func.func @transform_0(%arg0: i32) -> (i32, i32) {
    %c0_i32 = arith.constant 0 : i32
    %c0_i32_0 = arith.constant 0 : i32
    %c0_i32_1 = arith.constant 0 : i32
    return %c0_i32, %c0_i32_0 : i32, i32
  }
  func.func @transform_1(%arg0: i32) -> (i32, i32) {
    %c0_i32 = arith.constant 0 : i32
    %c0_i32_0 = arith.constant 0 : i32
    return %arg0, %c0_i32 : i32, i32
  }
  func.func @transform_2(%arg0: i32) -> (i32, i32) {
    %c0_i32 = arith.constant 0 : i32
    %c0_i32_0 = arith.constant 0 : i32
    return %arg0, %c0_i32 : i32, i32
  }
}

</mosaic_0001>

<bundles_post_ra>
// kernel: tpu_custom_call.1
= control target key start
LH: loop header
LB: loop body
LE: loop exit
PB: predicated region body
PF: predicated region fallthrough
CT: control target
= control target key end

     0   :  { %7 = vsyncpa [#allocation3], 0  ;;  %s179_s0 = inlined_call_operand.hbm [shape: f32[1,128], index: 0, kind: input, shape index: {}]   ;;  %s180_s1 = inlined_call_operand.hbm [shape: f32[4,128], index: 1, kind: input, shape index: {}]   ;;  %s181_s2 = inlined_call_operand.hbm [shape: f32[4,128], index: 2, kind: output, shape index: {}]  }
   0x1   :  { %8 = vsyncpa [#allocation6], 0 }
   0x2   :  { %9 = vsyncpa [#allocation4], 0  ;;  %s15_s11 = sshll.u32 %s179_s0, 4  ;;  %s152_s12 = smov [#allocation2]   ;;  %s16_s11 = int_to_ptr.hbm [resolvable:$true] %s15_s11 }
   0x3   :  { %s17_s13 = sshll.u32 %s152_s12, 4  ;;  %s26_s16 = sshll.u32 %s180_s1, 4  ;;  %s18_s13 = int_to_ptr.vmem [resolvable:$true] %s17_s13  ;;  %s27_s16 = int_to_ptr.hbm [resolvable:$true] %s26_s16 }
   0x4   :  { %20 = dma.hbm_to_vmem [thread:$0]  %s16_s11, 16, %s18_s13, [#allocation3]  }
   0x5   :  { %s153_s17 = smov [#allocation5]  }
   0x6   :  { %s28_s18 = sshll.u32 %s153_s17, 4  ;;  %s29_s18 = int_to_ptr.vmem [resolvable:$true] %s28_s18 }
   0x7   :  { %31 = dma.hbm_to_vmem [thread:$0]  %s27_s16, 64, %s29_s18, [#allocation6]  }
   0x8   :  { %146 = dma.done.wait [#allocation3], 16  }
   0x9   :  { %147 = vsyncadd [#allocation3], 4294967280 }
   0xa   :  { %148 = dma.done.wait [#allocation6], 64  }
   0xb   :  { %149 = vsyncadd [#allocation6], 4294967232  ;;  %v40_v0 = vld [vmem:[#allocation5] sm:$0xf]  ;;  %v71_v1 = vld [vmem:[#allocation2] ss:$0 sm:$0xff] }
   0xc   :  { %72 = vtanh.f32 %v40_v0  ;;  %v46_v2 = vmul.f32 %v71_v1, %v40_v0  ;;  %s154_s0 = smov [#allocation7]   ;;  %s57_s1 = sshll.u32 %s181_s2, 4  ;;  %s58_s1 = int_to_ptr.hbm [resolvable:$true] %s57_s1 }
   0xd   :  { %s55_s19 = sshll.u32 %s154_s0, 4  ;;  %s56_s19 = int_to_ptr.vmem [resolvable:$true] %s55_s19 }
   0xe   :  { %v47_v3 = vadd.f32 1.0, %v46_v2 }
  0x12   :  { %v73_v4 = vpop.eup %72 }
  0x13   :  { %v48_v5 = vmul.f32 %v73_v4, %v47_v3 }
  0x15   :  { %49 = vst [vmem:[#allocation7] sm:$0xf] %v48_v5 }
  0x16   :  { %60 = dma.vmem_to_hbm [thread:$0]  %s56_s19, 64, %s58_s1, [#allocation4]  }
  0x17   :  { %150 = dma.done.wait [#allocation4], 64  }
  0x18   :  { %151 = vsyncadd [#allocation4], 4294967232 }
  0x19   :  { %65 = vsyncpa [#allocation3], 1 }
  0x1a   :  { %66 = vsyncpa [#allocation6], 1 }
  0x1b   :  { %67 = vsyncpa [#allocation4], 1 }

</bundles_post_ra>
